<compile_context>
chip_gen: v7x
topology: tpu7x:2x2x1
jax: 0.10.0
libtpu: 0.0.40
codegen_flags: <defaults>
</compile_context>

<pallas_src>
import jax
import jax.numpy as jnp
from jax.experimental import pallas as pl
from jax.experimental.pallas import tpu as pltpu


def _round_up(x, m):
    return (x + m - 1) // m * m


def _fc_kernel(x_ref, w_ref, b_ref, o_ref):
    # x_ref: (C_in, TN)   spatial tile of one batch element
    # w_ref: (C_out, C_in) resident weight block
    # b_ref: (C_out, 1)    resident bias column
    acc = jnp.dot(w_ref[...], x_ref[...], preferred_element_type=jnp.float32)
    o_ref[...] = (acc + b_ref[...]).astype(o_ref.dtype)


# Keep the kernel VMEM footprint comfortably under v5e's 16 MiB default scoped
# VMEM (and far under v7x's 64 MiB physical VMEM) without having to raise
# vmem_limit_bytes: 2x (double-buffered) x tile + 2x out tile + resident W/b.
_VMEM_BUDGET_BYTES = 12 * 1024 * 1024
_MAX_TILE = 8192  # lanes per spatial tile


@jax.jit
def fc_layer(x_nchw, weight, bias):
    """1x1 Conv2d forward.

    x_nchw : [B, C_in, H, W]
    weight : [C_out, C_in]   (Conv2d weight [C_out, C_in, 1, 1] squeezed)
    bias   : [C_out]
    returns: [B, C_out, H, W]
    """
    B, C_in, H, W = x_nchw.shape
    C_out = weight.shape[0]
    S = H * W

    dsize = jnp.dtype(x_nchw.dtype).itemsize
    # Largest spatial tile (multiple of 128) that fits the VMEM budget, capped
    # at the 128-rounded spatial extent so small inputs use a single tile.
    resident_bytes = (C_out * C_in + C_out) * dsize
    per_col_bytes = 2 * (C_in + C_out) * dsize          # 2x = double buffering
    cap = max(128, (_VMEM_BUDGET_BYTES - resident_bytes) // max(per_col_bytes, 1))
    tn = min(_round_up(S, 128), (cap // 128) * 128, _MAX_TILE)
    tn = max(tn, 128)

    S_pad = _round_up(S, tn)

    x3 = x_nchw.reshape(B, C_in, S)                     # free reshape of NCHW
    if S_pad != S:
        x3 = jnp.pad(x3, ((0, 0), (0, 0), (0, S_pad - S)))

    w = weight.astype(x_nchw.dtype)                     # (C_out, C_in)
    b2 = bias.astype(jnp.float32).reshape(C_out, 1)     # (C_out, 1)

    out3 = pl.pallas_call(
        _fc_kernel,
        out_shape=jax.ShapeDtypeStruct((B, C_out, S_pad), x_nchw.dtype),
        grid_spec=pltpu.PrefetchScalarGridSpec(
            num_scalar_prefetch=0,
            grid=(B, S_pad // tn),
            in_specs=[
                # x: one batch element (squeezed), full C_in, one spatial tile
                pl.BlockSpec((None, C_in, tn), lambda b, j: (b, 0, j)),
                # weight / bias: resident, same block every step (no re-DMA)
                pl.BlockSpec((C_out, C_in), lambda b, j: (0, 0)),
                pl.BlockSpec((C_out, 1), lambda b, j: (0, 0)),
            ],
            out_specs=pl.BlockSpec((None, C_out, tn), lambda b, j: (b, 0, j)),
        ),
        compiler_params=pltpu.CompilerParams(
            dimension_semantics=("parallel", "parallel")),
    )(x3, w, b2)

    # TODO(synk): for production-sized channel counts (C_in*C_out weight of
    # multiple MiB) add grid axes over C_out (parallel) and C_in (arbitrary,
    # last) with an f32 VMEM accumulator + pl.when init/finalize, and feed
    # bf16 operands on v6e/v7x.

    if S_pad != S:
        out3 = out3[:, :, :S]
    return out3.reshape(B, C_out, H, W)


def init_params(key, c_in, c_out):
    """Deterministic init mimicking nn.Conv2d defaults (kaiming_uniform,
    a=sqrt(5) -> bound = 1/sqrt(fan_in) for a 1x1 kernel)."""
    kw, kb = jax.random.split(key)
    fan_in = c_in * 1 * 1
    bound = 1.0 / jnp.sqrt(fan_in)
    weight = jax.random.uniform(kw, (c_out, c_in), jnp.float32, -bound, bound)
    bias = jax.random.uniform(kb, (c_out,), jnp.float32, -bound, bound)
    return weight, bias


if __name__ == "__main__":
    key = jax.random.PRNGKey(0)
    kx, kp = jax.random.split(key)

    B, C_in, C_out, H, W = 2, 4, 8, 16, 16
    x = jax.random.normal(kx, (B, C_in, H, W), jnp.float32)
    weight, bias = init_params(kp, C_in, C_out)

    out = fc_layer(x, weight, bias)
    out = jax.block_until_ready(out)

    # Reference check against plain-JAX 1x1 conv (einsum over channels).
    ref = jnp.einsum("bchw,oc->bohw", x, weight) + bias[None, :, None, None]
    assert out.shape == (B, C_out, H, W)
    assert jnp.allclose(out, ref, atol=1e-4, rtol=1e-4)

    print("KERNEL_OK")
</pallas_src>

<mosaic_0001>
module attributes {stable_mosaic.version = 11 : i64} {
  func.func @_fc_kernel(%arg0: i32, %arg1: i32, %arg2: memref<1x4x256xf32, #tpu.memory_space<vmem>>, %arg3: memref<8x4xf32, #tpu.memory_space<vmem>>, %arg4: memref<8x1xf32, #tpu.memory_space<vmem>>, %arg5: memref<1x8x256xf32, #tpu.memory_space<vmem>>) attributes {dimension_semantics = [#tpu.dimension_semantics<parallel>, #tpu.dimension_semantics<parallel>], iteration_bounds = array<i64: 2, 1>, scalar_prefetch = 0 : i64, scratch_operands = 0 : i64, tpu.core_type = #tpu.core_type<tc>, window_params = [{transform_indices = @transform_0, window_bounds = array<i64: 1, 4, 256>}, {pipeline_mode = #tpu.pipeline_mode<synchronous>, transform_indices = @transform_1, window_bounds = array<i64: 8, 4>}, {pipeline_mode = #tpu.pipeline_mode<synchronous>, transform_indices = @transform_2, window_bounds = array<i64: 8, 1>}, {transform_indices = @transform_3, window_bounds = array<i64: 1, 8, 256>}]} {
    %c0 = arith.constant 0 : index
    %c0_0 = arith.constant 0 : index
    %0 = vector.load %arg3[%c0, %c0_0] : memref<8x4xf32, #tpu.memory_space<vmem>>, vector<8x4xf32>
    %c0_1 = arith.constant 0 : index
    %c0_2 = arith.constant 0 : index
    %c0_3 = arith.constant 0 : index
    %1 = vector.load %arg2[%c0_1, %c0_2, %c0_3] : memref<1x4x256xf32, #tpu.memory_space<vmem>>, vector<1x4x256xf32>
    %2 = vector.shape_cast %1 : vector<1x4x256xf32> to vector<4x256xf32>
    %cst = arith.constant dense<0.000000e+00> : vector<8x256xf32>
    %3 = tpu.matmul %0, %2, %cst {dimension_numbers = #tpu.dot_dimension_numbers<[1], [0], [0], [1], [0, 0, 1, 1], [], []>} : vector<8x4xf32>, vector<4x256xf32>, vector<8x256xf32> -> vector<8x256xf32>
    %c0_4 = arith.constant 0 : index
    %c0_5 = arith.constant 0 : index
    %4 = vector.load %arg4[%c0_4, %c0_5] : memref<8x1xf32, #tpu.memory_space<vmem>>, vector<8x1xf32>
    %5 = vector.broadcast %4 : vector<8x1xf32> to vector<8x256xf32>
    %6 = arith.addf %3, %5 : vector<8x256xf32>
    %c0_6 = arith.constant 0 : index
    %c0_7 = arith.constant 0 : index
    %c0_8 = arith.constant 0 : index
    %7 = vector.load %arg5[%c0_6, %c0_7, %c0_8] : memref<1x8x256xf32, #tpu.memory_space<vmem>>, vector<1x8x256xf32>
    %8 = vector.shape_cast %7 : vector<1x8x256xf32> to vector<8x256xf32>
    %9 = vector.shape_cast %6 : vector<8x256xf32> to vector<1x8x256xf32>
    tpu.vector_store %arg5[%c0_6, %c0_7, %c0_8], %9 {strides = array<i32>} : memref<1x8x256xf32, #tpu.memory_space<vmem>>, vector<1x8x256xf32>,
    return
  }
  func.func @transform_0(%arg0: i32, %arg1: i32) -> (i32, i32, i32) {
    %c0_i32 = arith.constant 0 : i32
    %c0_i32_0 = arith.constant 0 : i32
    return %arg0, %c0_i32, %arg1 : i32, i32, i32
  }
  func.func @transform_1(%arg0: i32, %arg1: i32) -> (i32, i32) {
    %c0_i32 = arith.constant 0 : i32
    %c0_i32_0 = arith.constant 0 : i32
    %c0_i32_1 = arith.constant 0 : i32
    return %c0_i32, %c0_i32_0 : i32, i32
  }
  func.func @transform_2(%arg0: i32, %arg1: i32) -> (i32, i32) {
    %c0_i32 = arith.constant 0 : i32
    %c0_i32_0 = arith.constant 0 : i32
    %c0_i32_1 = arith.constant 0 : i32
    return %c0_i32, %c0_i32_0 : i32, i32
  }
  func.func @transform_3(%arg0: i32, %arg1: i32) -> (i32, i32, i32) {
    %c0_i32 = arith.constant 0 : i32
    %c0_i32_0 = arith.constant 0 : i32
    return %arg0, %c0_i32, %arg1 : i32, i32, i32
  }
}

</mosaic_0001>

<bundles_post_ra>
// kernel: fc_layer.1
= control target key start
LH: loop header
LB: loop body
LE: loop exit
PB: predicated region body
PF: predicated region fallthrough
CT: control target
= control target key end

     0   :  { %s479_s12 = smov 0   ;;  %s481_s13 = smov 0   ;;  %s518_s0 = inlined_call_operand.vmem [shape: f32[2,4,256], index: 0, kind: input, shape index: {}]   ;;  %s519_s1 = inlined_call_operand.vmem [shape: f32[8,4], index: 1, kind: input, shape index: {}]   ;;  %s520_s2 = inlined_call_operand.vmem [shape: f32[8,1], index: 2, kind: input, shape index: {}]   ;;  %s521_s3 = inlined_call_operand.vmem [shape: f32[2,8,256], index: 3, kind: output, shape index: {}]  }
   0x1   :  { %s483_s14 = smov 0  }
   0x2 LB: > { %s25_s15 = sadd.s32 1, %s451_s13  ;;  %p393_p0 = scmp.ge.s32.totalorder %s455_s14, 1  ;;  %s455_s14 = sphi %s483_s14, %s13_s14   ;;  %s451_s13 = sphi %s481_s13, %s523_s13   ;;  %s447_s12 = sphi %s479_s12, %s522_s12  }
   0x3   : > { %p27_p1 = scmp.ge.s32.totalorder %s25_s15, 2  ;;  %p158_p2 = scmp.lt.s32.totalorder %s455_s14, 3 }
   0x5   : > { %s525_s15 = smov (%p27_p1, %s25_s15), 0  ;;  %p159_p3 = pnand %p393_p0, %p158_p2 }
   0x6   : > { %p191_p4 = scmp.lt.s32.totalorder (!%p159_p3), %s447_s12, 1  ;;  %v457_v0 = vmov (!%p159_p3), 0.0   ;;  %v458_v1 = vmov (!%p159_p3), 0   ;;  %v212_v2 = vld [vmem:[%s520_s2] sm:$0xff] (!%p159_p3)  ;;  %vm224_vm0 = vcmask (!%p159_p3), 1043456   ;;  %vm220_vm1 = vcmask (!%p159_p3), 31744  }
   0x7   : > { %162 = sbr.rel (%p159_p3) target bundleno = 238 (0xee), region = 32  ;;  %293 = vmatprep.mubr.f32.mxu0 (!%p159_p3), %v457_v0  ;;  %431 = vset.pattern.permute.xlu0 (!%p159_p3), %v458_v1  ;;  %v210_v5 = vld [vmem:[%s519_s1] sm:$0xff] (!%p159_p3) }
   0x8   : > { %215 = vperm.xlu0 (!%p159_p3), %431, %v212_v2  }
   0xe   : > { %s527_s12 = smov (!%p191_p4, %s447_s12), 1 }
   0xf   : > { %s403_s18 = sshll.u32 %s527_s12, 3  ;;  %s404_s24 = sshll.u32 %s527_s12, 4 }
  0x10   : > { %s198_s21 = scalar_lea.vmem %s518_s0, %s403_s18  ;;  %s208_s27 = scalar_lea.vmem %s521_s3, %s404_s24 }
  0x11   : > { %v211_v3 = vld [vmem:[%s198_s21] sm:$0xff] }
  0x12   : > { %v219_v4 = vcombine.high %v211_v3, %v211_v3 }
  0x14   : > { %398 = vmatprep.subr.msk.mxu0 %vm224_vm0, %v219_v4 }
  0x15   : > { %399 = vmatpush1.msk.msra.mxu0 %vm224_vm0, %v211_v3 }
  0x16   : > { %400 = vmatmul.mubr.msk.f32.vlgmr.msra.gmra.mrb[0].mxu0 %vm220_vm1, %v210_v5 }
  0x87   : > { %v216_v6 = vpop.permute.xlu0 %215 }
  0xe9   : > { %v295_v7 = vpop.f32.mrb[0].mxu0 }
  0xea   : > { %v296_v8 = vadd.f32 %v295_v7, %v216_v6  ;;  %v297_v9 = vpop.f32.mrb[1].mxu0 }
  0xeb   : > { %v298_v10 = vadd.f32 %v297_v9, %v216_v6 }
  0xec   : > { %300 = vst [vmem:[%s208_s27] sm:$0xff] %v296_v8 }
  0xed   : > { %301 = vst [vmem:[%s208_s27 + $0x8] sm:$0xff] %v298_v10 }
  0xee PF: > { %s13_s14 = sadd.s32 1, %s455_s14   ;;  %s522_s12 = smov %s451_s13 }
  0xef   : > { %p10_p5 = scmp.ge.s32.totalorder %s13_s14, 4   ;;  %s523_s13 = smov %s525_s15 }
  0xf1   :  { %12 = sbr.rel (!%p10_p5) target bundleno = 2 (0x2), region = 62 }

</bundles_post_ra>
